<compile_context>
chip_gen: v5e
topology: v5e:2x2
jax: 0.10.0
libtpu: 0.0.40
codegen_flags: <defaults>
</compile_context>

<pallas_src>
import functools
import itertools
import math

import numpy as np
import jax
import jax.numpy as jnp
from jax.experimental import pallas as pl
from jax.experimental.pallas import tpu as pltpu


# ---------------------------------------------------------------------------
# Phase matrix construction (host-side numpy, mirrors the torch module)
# ---------------------------------------------------------------------------
def _get_phasevector(n_states: int, n_phases: int) -> np.ndarray:
    vec = []
    for state in range(n_states):
        sublist = [-1] * state + [1] * (n_states - state)
        vec.extend([list(x) for x in set(itertools.permutations(sublist, n_states))])
    vec_icond = [p for p in vec if p[0] == 1]
    assert len(vec_icond) == n_phases, (
        f"Found {len(vec_icond)} permutations, but expects {n_phases} phases."
    )
    return np.transpose(np.array(vec_icond, dtype=np.float32))  # (n_states, n_phases)


def get_phasematrix(n_states: int, n_phases: int, n_couplings: int) -> np.ndarray:
    phasevec = _get_phasevector(n_states, n_phases)  # (n_states, n_phases)
    istates, jstates = np.triu_indices(n_states, k=1)
    e_ik = phasevec[istates, :]
    e_jk = phasevec[jstates, :]
    assert e_ik.shape == (n_couplings, n_phases)
    assert e_jk.shape == (n_couplings, n_phases)
    return (e_ik * e_jk).astype(np.float32)  # (n_couplings, n_phases), entries in {-1,+1}


def _cdiv(a: int, b: int) -> int:
    return -(-a // b)


# ---------------------------------------------------------------------------
# Kernels
# ---------------------------------------------------------------------------
def _mask_rows(x, rows_total):
    """Zero out rows whose global index is >= rows_total (ragged last tile)."""
    tr = x.shape[0]
    row0 = (pl.program_id(0) * pl.num_programs(1) + pl.program_id(1)) * tr
    rid = jax.lax.broadcasted_iota(jnp.int32, (tr, 1), 0) + row0
    return jnp.where(rid < rows_total, x, 0.0)


def _phase_prop_mse_kernel(pred_ref, tgt_ref, a_ref, b_ref, *,
                           base: int, rows_total: int, need_mask: bool):
    """MSE path: (o*ph - t)^2 = o^2 + t^2 - 2*ph*(o*t), ph in {-1,+1}.

    a_ref : (8, D)    resident accumulator of lane-wise sums of o^2 + t^2.
    b_ref : (base, D) resident accumulator; row p holds lane-wise sums of o*t over all
            rows with (global_row % base) == p  (coupling index = p % n_couplings).
    """
    r = pl.program_id(1)

    @pl.when(r == 0)
    def _():
        a_ref[...] = jnp.zeros_like(a_ref)
        b_ref[...] = jnp.zeros_like(b_ref)

    o = pred_ref[...].astype(jnp.float32)
    t = tgt_ref[...].astype(jnp.float32)
    tr, dp = o.shape

    if need_mask:
        o = _mask_rows(o, rows_total)
        t = _mask_rows(t, rows_total)

    sq = o * o + t * t
    prod = o * t

    # Tiling-aligned (sublane-group) reductions -> pure vreg adds, unmasked full stores.
    a_ref[...] += jnp.sum(sq.reshape(tr // 8, 8, dp), axis=0)
    b_ref[...] += jnp.sum(prod.reshape(tr // base, base, dp), axis=0)


def _phase_prop_l1_kernel(pred_ref, tgt_ref, pos_ref, neg_ref, *,
                          base: int, rows_total: int, need_mask: bool):
    """L1 path: |o*ph - t| = |o - t| (ph=+1) or |o + t| (ph=-1).

    pos_ref / neg_ref : (base, D) resident accumulators of per-coupling-slot lane-wise
    sums of |o - t| and |o + t| respectively.
    """
    r = pl.program_id(1)

    @pl.when(r == 0)
    def _():
        pos_ref[...] = jnp.zeros_like(pos_ref)
        neg_ref[...] = jnp.zeros_like(neg_ref)

    o = pred_ref[...].astype(jnp.float32)
    t = tgt_ref[...].astype(jnp.float32)
    tr, dp = o.shape

    if need_mask:
        o = _mask_rows(o, rows_total)
        t = _mask_rows(t, rows_total)

    pos = jnp.abs(o - t)
    neg = jnp.abs(o + t)

    pos_ref[...] += jnp.sum(pos.reshape(tr // base, base, dp), axis=0)
    neg_ref[...] += jnp.sum(neg.reshape(tr // base, base, dp), axis=0)


# ---------------------------------------------------------------------------
# Wrapper
# ---------------------------------------------------------------------------
def phase_prop_loss(output: jax.Array, target: jax.Array, phasemat: jax.Array,
                    mse: bool = True, target_block_bytes: int = 2 * 1024 * 1024,
                    num_splits: int = 2) -> jax.Array:
    """Scalar loss = min over phases of mean error between output*phase and target.

    NOTE: the MSE fast path assumes phasemat entries are strictly in {-1, +1}
    (always true for the module's constructed phase matrix).
    """
    assert output.shape == target.shape and output.ndim == 3
    B, C, D = output.shape
    assert phasemat.shape[0] == C, (
        f"Found {C} couplings, but expect {phasemat.shape[0]}."
    )
    P = phasemat.shape[1]
    N = B * C * D
    R = B * C

    # Lane/sublane-dense 2D layout: (B, C, D) -> (B*C, D)  (free reshape, no copies).
    pred2 = output.reshape(R, D)
    tgt2 = target.reshape(R, D)

    # Row tiles are multiples of lcm(8, C): sublane-aligned and the coupling pattern
    # (row % C) is identical in every tile.
    base = (8 * C) // math.gcd(8, C)
    itemsize = jnp.dtype(output.dtype).itemsize

    if R < base:
        # Tiny input: pad rows once to a single aligned tile (zeros contribute nothing).
        pred2 = jnp.pad(pred2, ((0, base - R), (0, 0)))
        tgt2 = jnp.pad(tgt2, ((0, base - R), (0, 0)))
        Rw = base
    else:
        Rw = R   # no padding copies for large inputs; ragged tail is masked in-kernel

    # Row tile from a VMEM byte budget, never larger than the data.
    rows_budget = max(base, (target_block_bytes // max(1, D * itemsize)) // base * base)
    tr = min(rows_budget, base * (Rw // base))
    n_tiles = _cdiv(Rw, tr)
    need_mask = (Rw % tr) != 0

    # Leading "parallel" axis: largest divisor of n_tiles that is <= num_splits
    # (keeps every block offset in-bounds; 2 splits lets v7x use both TensorCores).
    ns = 1
    for d in range(min(max(1, num_splits), n_tiles), 0, -1):
        if n_tiles % d == 0:
            ns = d
            break
    nt = n_tiles // ns

    in_specs = [
        pl.BlockSpec((tr, D), lambda s, r: (s * nt + r, 0)),
        pl.BlockSpec((tr, D), lambda s, r: (s * nt + r, 0)),
    ]
    grid = (ns, nt)
    cparams = pltpu.CompilerParams(
        dimension_semantics=("parallel", "arbitrary"),
        vmem_limit_bytes=32 * 1024 * 1024,
    )
    cost = pl.CostEstimate(flops=6 * R * D, transcendentals=0,
                           bytes_accessed=2 * R * D * itemsize)

    # Per-row-slot phase signs (tiny, wrapper-side): T[p, l] = phasemat[p % C, l].
    T = phasemat.astype(jnp.float32)[jnp.arange(base) % C, :]   # (base, P)

    if mse:
        kernel = functools.partial(_phase_prop_mse_kernel, base=base,
                                   rows_total=R, need_mask=need_mask)
        a_part, b_part = pl.pallas_call(
            kernel,
            grid=grid,
            in_specs=in_specs,
            out_specs=[
                pl.BlockSpec((8, D), lambda s, r: (s, 0)),
                pl.BlockSpec((base, D), lambda s, r: (s, 0)),
            ],
            out_shape=(
                jax.ShapeDtypeStruct((ns * 8, D), jnp.float32),
                jax.ShapeDtypeStruct((ns * base, D), jnp.float32),
            ),
            compiler_params=cparams,
            cost_estimate=cost,
        )(pred2, tgt2)
        total_sq = jnp.sum(a_part)                               # sum(o^2 + t^2)
        S = jnp.sum(b_part.reshape(ns, base, D), axis=(0, 2))    # per-slot sum(o*t)
        per_phase = total_sq - 2.0 * (S @ T)                     # sum((o*ph_l - t)^2)
        return jnp.min(per_phase) / jnp.float32(N)
    else:
        kernel = functools.partial(_phase_prop_l1_kernel, base=base,
                                   rows_total=R, need_mask=need_mask)
        pos_part, neg_part = pl.pallas_call(
            kernel,
            grid=grid,
            in_specs=in_specs,
            out_specs=[
                pl.BlockSpec((base, D), lambda s, r: (s, 0)),
                pl.BlockSpec((base, D), lambda s, r: (s, 0)),
            ],
            out_shape=(
                jax.ShapeDtypeStruct((ns * base, D), jnp.float32),
                jax.ShapeDtypeStruct((ns * base, D), jnp.float32),
            ),
            compiler_params=cparams,
            cost_estimate=cost,
        )(pred2, tgt2)
        S_pos = jnp.sum(pos_part.reshape(ns, base, D), axis=(0, 2))  # per-slot sum|o-t|
        S_neg = jnp.sum(neg_part.reshape(ns, base, D), axis=(0, 2))  # per-slot sum|o+t|
        per_phase = S_pos @ (0.5 * (1.0 + T)) + S_neg @ (0.5 * (1.0 - T))
        return jnp.min(per_phase) / jnp.float32(N)


# ---------------------------------------------------------------------------
# Pure-JAX reference (mirrors the torch forward) for a sanity check.
# ---------------------------------------------------------------------------
def phase_prop_loss_ref(output, target, phasemat, mse: bool = True):
    P = phasemat.shape[1]
    losses = []
    for l in range(P):
        diff = output * phasemat[:, l][None, :, None] - target
        losses.append(jnp.mean(diff * diff) if mse else jnp.mean(jnp.abs(diff)))
    return jnp.min(jnp.stack(losses))


if __name__ == "__main__":
    # Module hyper-parameters (torch __init__ defaults for n_states=3).
    n_states = 3
    n_couplings = int(0.5 * n_states * (n_states - 1))   # 3
    n_phases = int(2 ** (n_states - 1))                   # 4
    phasemat_np = get_phasematrix(n_states, n_phases, n_couplings)  # (3, 4)
    # Required for the MSE algebraic rewrite (ph^2 == 1).
    assert np.all(np.abs(phasemat_np) == 1.0)
    phasemat = jnp.asarray(phasemat_np)

    mse_fn = jax.jit(functools.partial(phase_prop_loss, mse=True))
    l1_fn = jax.jit(functools.partial(phase_prop_loss, mse=False))

    key = jax.random.PRNGKey(0)

    # Test 1: small aligned shape (batch=2, couplings=3, feature=128).
    k1, k2, key = jax.random.split(key, 3)
    out1 = jax.random.normal(k1, (2, n_couplings, 128), dtype=jnp.float32)
    tgt1 = jax.random.normal(k2, (2, n_couplings, 128), dtype=jnp.float32)
    loss_mse = jax.block_until_ready(mse_fn(out1, tgt1, phasemat))
    ref_mse = jax.block_until_ready(phase_prop_loss_ref(out1, tgt1, phasemat, mse=True))
    np.testing.assert_allclose(np.asarray(loss_mse), np.asarray(ref_mse),
                               rtol=1e-4, atol=1e-5)
    loss_l1 = jax.block_until_ready(l1_fn(out1, tgt1, phasemat))
    ref_l1 = jax.block_until_ready(phase_prop_loss_ref(out1, tgt1, phasemat, mse=False))
    np.testing.assert_allclose(np.asarray(loss_l1), np.asarray(ref_l1),
                               rtol=1e-4, atol=1e-5)

    # Test 2: ragged rows + non-128 feature dim (exercises the in-kernel mask, 2 splits).
    k3, k4, key = jax.random.split(key, 3)
    out2 = jax.random.normal(k3, (12, n_couplings, 50), dtype=jnp.float32)
    tgt2 = jax.random.normal(k4, (12, n_couplings, 50), dtype=jnp.float32)
    loss_mse2 = jax.block_until_ready(mse_fn(out2, tgt2, phasemat))
    ref_mse2 = jax.block_until_ready(phase_prop_loss_ref(out2, tgt2, phasemat, mse=True))
    np.testing.assert_allclose(np.asarray(loss_mse2), np.asarray(ref_mse2),
                               rtol=1e-4, atol=1e-5)
    loss_l12 = jax.block_until_ready(l1_fn(out2, tgt2, phasemat))
    ref_l12 = jax.block_until_ready(phase_prop_loss_ref(out2, tgt2, phasemat, mse=False))
    np.testing.assert_allclose(np.asarray(loss_l12), np.asarray(ref_l12),
                               rtol=1e-4, atol=1e-5)

    print("KERNEL_OK")
</pallas_src>

<mosaic_0001>
module attributes {stable_mosaic.version = 11 : i64} {
  func.func @_phase_prop_mse_kernel(%arg0: i32, %arg1: i32, %arg2: memref<24x128xf32, #tpu.memory_space<vmem>>, %arg3: memref<24x128xf32, #tpu.memory_space<vmem>>, %arg4: memref<8x128xf32, #tpu.memory_space<vmem>>, %arg5: memref<24x128xf32, #tpu.memory_space<vmem>>) attributes {dimension_semantics = [#tpu.dimension_semantics<parallel>, #tpu.dimension_semantics<arbitrary>], iteration_bounds = array<i64: 1, 1>, scalar_prefetch = 0 : i64, scratch_operands = 0 : i64, tpu.core_type = #tpu.core_type<tc>, window_params = [{transform_indices = @transform_0, window_bounds = array<i64: 24, 128>}, {transform_indices = @transform_1, window_bounds = array<i64: 24, 128>}, {transform_indices = @transform_2, window_bounds = array<i64: 8, 128>}, {transform_indices = @transform_3, window_bounds = array<i64: 24, 128>}]} {
    %c0_i32 = arith.constant 0 : i32
    %0 = arith.cmpi eq, %arg1, %c0_i32 : i32
    %1 = arith.extui %0 : i1 to i32
    %c0_i32_0 = arith.constant 0 : i32
    %2 = arith.cmpi ne, %1, %c0_i32_0 : i32
    scf.if %2 {
      %cst_13 = arith.constant 0.000000e+00 : f32
      %19 = vector.broadcast %cst_13 : f32 to vector<8x128xf32>
      %c0_14 = arith.constant 0 : index
      %c0_15 = arith.constant 0 : index
      %20 = vector.load %arg4[%c0_14, %c0_15] : memref<8x128xf32, #tpu.memory_space<vmem>>, vector<8x128xf32>
      tpu.vector_store %arg4[%c0_14, %c0_15], %19 {strides = array<i32>} : memref<8x128xf32, #tpu.memory_space<vmem>>, vector<8x128xf32>,
      %cst_16 = arith.constant 0.000000e+00 : f32
      %21 = vector.broadcast %cst_16 : f32 to vector<24x128xf32>
      %c0_17 = arith.constant 0 : index
      %c0_18 = arith.constant 0 : index
      %22 = vector.load %arg5[%c0_17, %c0_18] : memref<24x128xf32, #tpu.memory_space<vmem>>, vector<24x128xf32>
      tpu.vector_store %arg5[%c0_17, %c0_18], %21 {strides = array<i32>} : memref<24x128xf32, #tpu.memory_space<vmem>>, vector<24x128xf32>,
    } else {
    }
    %c0 = arith.constant 0 : index
    %c0_1 = arith.constant 0 : index
    %3 = vector.load %arg2[%c0, %c0_1] : memref<24x128xf32, #tpu.memory_space<vmem>>, vector<24x128xf32>
    %c0_2 = arith.constant 0 : index
    %c0_3 = arith.constant 0 : index
    %4 = vector.load %arg3[%c0_2, %c0_3] : memref<24x128xf32, #tpu.memory_space<vmem>>, vector<24x128xf32>
    %5 = arith.mulf %3, %3 : vector<24x128xf32>
    %6 = arith.mulf %4, %4 : vector<24x128xf32>
    %7 = arith.addf %5, %6 : vector<24x128xf32>
    %8 = arith.mulf %3, %4 : vector<24x128xf32>
    %c0_4 = arith.constant 0 : index
    %c0_5 = arith.constant 0 : index
    %9 = vector.load %arg4[%c0_4, %c0_5] : memref<8x128xf32, #tpu.memory_space<vmem>>, vector<8x128xf32>
    %10 = vector.shape_cast %7 : vector<24x128xf32> to vector<3x8x128xf32>
    %cst = arith.constant dense<0.000000e+00> : vector<8x128xf32>
    %11 = vector.multi_reduction <add>, %10, %cst [0] : vector<3x8x128xf32> to vector<8x128xf32>
    %12 = arith.addf %9, %11 : vector<8x128xf32>
    %c0_6 = arith.constant 0 : index
    %c0_7 = arith.constant 0 : index
    %13 = vector.load %arg4[%c0_6, %c0_7] : memref<8x128xf32, #tpu.memory_space<vmem>>, vector<8x128xf32>
    tpu.vector_store %arg4[%c0_6, %c0_7], %12 {strides = array<i32>} : memref<8x128xf32, #tpu.memory_space<vmem>>, vector<8x128xf32>,
    %c0_8 = arith.constant 0 : index
    %c0_9 = arith.constant 0 : index
    %14 = vector.load %arg5[%c0_8, %c0_9] : memref<24x128xf32, #tpu.memory_space<vmem>>, vector<24x128xf32>
    %15 = vector.shape_cast %8 : vector<24x128xf32> to vector<1x24x128xf32>
    %cst_10 = arith.constant dense<0.000000e+00> : vector<24x128xf32>
    %16 = vector.multi_reduction <add>, %15, %cst_10 [0] : vector<1x24x128xf32> to vector<24x128xf32>
    %17 = arith.addf %14, %16 : vector<24x128xf32>
    %c0_11 = arith.constant 0 : index
    %c0_12 = arith.constant 0 : index
    %18 = vector.load %arg5[%c0_11, %c0_12] : memref<24x128xf32, #tpu.memory_space<vmem>>, vector<24x128xf32>
    tpu.vector_store %arg5[%c0_11, %c0_12], %17 {strides = array<i32>} : memref<24x128xf32, #tpu.memory_space<vmem>>, vector<24x128xf32>,
    return
  }
  func.func @transform_0(%arg0: i32, %arg1: i32) -> (i32, i32) {
    %c1_i32 = arith.constant 1 : i32
    %0 = arith.muli %arg0, %c1_i32 : i32
    %1 = arith.addi %0, %arg1 : i32
    %c0_i32 = arith.constant 0 : i32
    %c0_i32_0 = arith.constant 0 : i32
    return %1, %c0_i32 : i32, i32
  }
  func.func @transform_1(%arg0: i32, %arg1: i32) -> (i32, i32) {
    %c1_i32 = arith.constant 1 : i32
    %0 = arith.muli %arg0, %c1_i32 : i32
    %1 = arith.addi %0, %arg1 : i32
    %c0_i32 = arith.constant 0 : i32
    %c0_i32_0 = arith.constant 0 : i32
    return %1, %c0_i32 : i32, i32
  }
  func.func @transform_2(%arg0: i32, %arg1: i32) -> (i32, i32) {
    %c0_i32 = arith.constant 0 : i32
    %c0_i32_0 = arith.constant 0 : i32
    return %arg0, %c0_i32 : i32, i32
  }
  func.func @transform_3(%arg0: i32, %arg1: i32) -> (i32, i32) {
    %c0_i32 = arith.constant 0 : i32
    %c0_i32_0 = arith.constant 0 : i32
    return %arg0, %c0_i32 : i32, i32
  }
}

</mosaic_0001>

<bundles_post_ra>
// kernel: phase_prop_loss.1
= control target key start
LH: loop header
LB: loop body
LE: loop exit
PB: predicated region body
PF: predicated region fallthrough
CT: control target
= control target key end

     0   :  { %s171_s0 = inlined_call_operand.vmem [shape: f32[24,128], index: 0, kind: input, shape index: {}]   ;;  %s172_s1 = inlined_call_operand.vmem [shape: f32[24,128], index: 1, kind: input, shape index: {}]   ;;  %s173_s3 = inlined_call_operand.vmem [shape: f32[24,128], index: 3, kind: output, shape index: {1}]   ;;  %s174_s2 = inlined_call_operand.vmem [shape: f32[8,128], index: 2, kind: output, shape index: {0}]  }
   0x1   :  { %v65_v0 = vld [vmem:[%s171_s0] sm:$0xff]  ;;  %v66_v1 = vld [vmem:[%s171_s0 + $0x8] sm:$0xff]  ;;  %v67_v2 = vld [vmem:[%s171_s0 + $0x10] sm:$0xff] }
   0x2   :  { %v68_v3 = vld [vmem:[%s172_s1] sm:$0xff]  ;;  %v69_v4 = vld [vmem:[%s172_s1 + $0x8] sm:$0xff]  ;;  %v70_v5 = vld [vmem:[%s172_s1 + $0x10] sm:$0xff]  ;;  %v71_v6 = vmul.f32 %v65_v0, %v65_v0  ;;  %v72_v7 = vmul.f32 %v66_v1, %v66_v1  ;;  %v73_v8 = vmul.f32 %v67_v2, %v67_v2 }
   0x3   :  { %v74_v9 = vmul.f32 %v68_v3, %v68_v3  ;;  %v75_v10 = vmul.f32 %v69_v4, %v69_v4  ;;  %v76_v11 = vmul.f32 %v70_v5, %v70_v5  ;;  %v80_v12 = vmul.f32 %v68_v3, %v65_v0 }
   0x4   :  { %v81_v13 = vmul.f32 %v69_v4, %v66_v1  ;;  %v82_v14 = vmul.f32 %v70_v5, %v67_v2 }
   0x5   :  { %v77_v15 = vadd.f32 %v74_v9, %v71_v6  ;;  %v78_v16 = vadd.f32 %v75_v10, %v72_v7  ;;  %v79_v17 = vadd.f32 %v76_v11, %v73_v8  ;;  %97 = vst [vmem:[%s173_s3] sm:$0xff] %v80_v12 }
   0x6   :  { %98 = vst [vmem:[%s173_s3 + $0x8] sm:$0xff] %v81_v13 }
   0x7   :  { %v84_v18 = vadd.f32 %v78_v16, %v77_v15  ;;  %99 = vst [vmem:[%s173_s3 + $0x10] sm:$0xff] %v82_v14 }
   0x9   :  { %v85_v19 = vadd.f32 %v84_v18, %v79_v17 }
   0xb   :  { %87 = vst [vmem:[%s174_s2] sm:$0xff] %v85_v19 }

</bundles_post_ra>
